<compile_context>
chip_gen: v6e
topology: v6e:2x2x1
jax: 0.10.0
libtpu: 0.0.40
codegen_flags: <defaults>
</compile_context>

<pallas_src>
import jax
import jax.numpy as jnp
from jax.experimental import pallas as pl
from jax.experimental.pallas import tpu as pltpu


def _round_up(x, m):
    return ((x + m - 1) // m) * m


def mlp_kernel(x_ref, w1_ref, b1_ref, w2_ref, b2_ref, o_ref):
    # x:  (TB, D_in)  bf16      w1: (D_in, H)   bf16    b1: (1, H)      f32
    # w2: (H, N_pad)  bf16      b2: (1, N_pad)  f32     o:  (TB, N_pad) f32
    x = x_ref[...]

    # Linear(20, 256): bf16 MXU matmul, f32 accumulation.
    h = jnp.dot(x, w1_ref[...], preferred_element_type=jnp.float32)
    # Bias + ReLU in f32 on the VPU.
    h = jnp.maximum(h + b1_ref[...], 0.0)

    # Linear(256, 10 -> padded to 128 lanes): bf16 MXU matmul, f32 accumulation.
    h = h.astype(w2_ref.dtype)
    out = jnp.dot(h, w2_ref[...], preferred_element_type=jnp.float32) + b2_ref[...]

    o_ref[...] = out.astype(o_ref.dtype)


def my_sequential_forward(x, w1, b1, w2, b2, *, block_b=1024,
                          compute_dtype=jnp.bfloat16):
    """Fused Linear -> ReLU -> Linear.

    x: (B, D_in) float32; weights stored (in_features, out_features).
    Returns (B, D_out) float32.
    """
    B, D_in = x.shape
    H = w1.shape[1]
    D_out = w2.shape[1]

    # ---- lane-dense output: pad the final N dimension to a full 128 lanes ----
    n_pad = _round_up(max(D_out, 128), 128)
    w2p = jnp.pad(w2.astype(compute_dtype), ((0, 0), (0, n_pad - D_out)))
    b2p = jnp.pad(b2.reshape(1, D_out).astype(jnp.float32),
                  ((0, 0), (0, n_pad - D_out)))

    # ---- bf16 matmul inputs, f32 biases ----
    xc = x.astype(compute_dtype)
    w1c = w1.astype(compute_dtype)
    b1c = b1.reshape(1, H).astype(jnp.float32)

    # ---- batch tiling: sublane-aligned tile, pad B up to a tile multiple ----
    tb = min(block_b, _round_up(B, 8))
    tb = _round_up(tb, 8)
    b_pad = _round_up(B, tb)
    if b_pad != B:
        xc = jnp.pad(xc, ((0, b_pad - B), (0, 0)))
    grid = (b_pad // tb,)

    out = pl.pallas_call(
        mlp_kernel,
        out_shape=jax.ShapeDtypeStruct((b_pad, n_pad), jnp.float32),
        grid=grid,
        in_specs=[
            # x streams per grid step.
            pl.BlockSpec((tb, D_in), lambda i: (i, 0)),
            # Weights / biases: constant block index -> DMA'd once, VMEM-resident.
            pl.BlockSpec((D_in, H), lambda i: (0, 0)),
            pl.BlockSpec((1, H), lambda i: (0, 0)),
            pl.BlockSpec((H, n_pad), lambda i: (0, 0)),
            pl.BlockSpec((1, n_pad), lambda i: (0, 0)),
        ],
        out_specs=pl.BlockSpec((tb, n_pad), lambda i: (i, 0)),
        compiler_params=pltpu.CompilerParams(
            dimension_semantics=("parallel",),   # shard batch across v7x's 2 TCs
            vmem_limit_bytes=64 << 20,
        ),
    )(xc, w1c, b1c, w2p, b2p)

    # Drop batch padding and the lane padding of the output.
    return out[:B, :D_out]


def init_params(key, d_in=20, d_hidden=256, d_out=10):
    """Deterministic init mimicking nn.Linear default (uniform +/- 1/sqrt(fan_in))."""
    k1, k2, k3, k4 = jax.random.split(key, 4)
    s1 = 1.0 / jnp.sqrt(jnp.float32(d_in))
    s2 = 1.0 / jnp.sqrt(jnp.float32(d_hidden))
    w1 = jax.random.uniform(k1, (d_in, d_hidden), jnp.float32, -s1, s1)
    b1 = jax.random.uniform(k2, (1, d_hidden), jnp.float32, -s1, s1)
    w2 = jax.random.uniform(k3, (d_hidden, d_out), jnp.float32, -s2, s2)
    b2 = jax.random.uniform(k4, (1, d_out), jnp.float32, -s2, s2)
    return w1, b1, w2, b2


def _ref(x, w1, b1, w2, b2):
    return jnp.maximum(x @ w1 + b1, 0.0) @ w2 + b2


if __name__ == "__main__":
    key = jax.random.PRNGKey(0)
    k_x, k_p, k_big = jax.random.split(key, 3)

    w1, b1, w2, b2 = init_params(k_p)

    # Matches `X = torch.rand(2, 20)` in the reference script.
    x = jax.random.uniform(k_x, (2, 20), jnp.float32)
    out = jax.block_until_ready(my_sequential_forward(x, w1, b1, w2, b2))
    ref = _ref(x, w1, b1, w2, b2)
    assert out.shape == (2, 10)
    # bf16 matmul inputs -> loosened tolerance vs the f32 reference.
    assert jnp.allclose(out, ref, atol=2e-2, rtol=2e-2)

    # Exercise the multi-step batch grid (streaming x / resident weights path).
    x_big = jax.random.uniform(k_big, (2048, 20), jnp.float32)
    out_big = jax.block_until_ready(
        my_sequential_forward(x_big, w1, b1, w2, b2, block_b=1024))
    ref_big = _ref(x_big, w1, b1, w2, b2)
    assert out_big.shape == (2048, 10)
    assert jnp.allclose(out_big, ref_big, atol=2e-2, rtol=2e-2)

    print("KERNEL_OK")
</pallas_src>

<mosaic_0001>
module attributes {stable_mosaic.version = 11 : i64} {
  func.func @mlp_kernel(%arg0: i32, %arg1: memref<8x20xbf16, #tpu.memory_space<vmem>>, %arg2: memref<20x256xbf16, #tpu.memory_space<vmem>>, %arg3: memref<1x256xf32, #tpu.memory_space<vmem>>, %arg4: memref<256x128xbf16, #tpu.memory_space<vmem>>, %arg5: memref<1x128xf32, #tpu.memory_space<vmem>>, %arg6: memref<8x128xf32, #tpu.memory_space<vmem>>) attributes {dimension_semantics = [#tpu.dimension_semantics<parallel>], iteration_bounds = array<i64: 1>, scalar_prefetch = 0 : i64, scratch_operands = 0 : i64, tpu.core_type = #tpu.core_type<tc>, window_params = [{transform_indices = @transform_0, window_bounds = array<i64: 8, 20>}, {pipeline_mode = #tpu.pipeline_mode<synchronous>, transform_indices = @transform_1, window_bounds = array<i64: 20, 256>}, {pipeline_mode = #tpu.pipeline_mode<synchronous>, transform_indices = @transform_2, window_bounds = array<i64: 1, 256>}, {pipeline_mode = #tpu.pipeline_mode<synchronous>, transform_indices = @transform_3, window_bounds = array<i64: 256, 128>}, {pipeline_mode = #tpu.pipeline_mode<synchronous>, transform_indices = @transform_4, window_bounds = array<i64: 1, 128>}, {transform_indices = @transform_5, window_bounds = array<i64: 8, 128>}]} {
    %c0 = arith.constant 0 : index
    %c0_0 = arith.constant 0 : index
    %0 = vector.load %arg1[%c0, %c0_0] : memref<8x20xbf16, #tpu.memory_space<vmem>>, vector<8x20xbf16>
    %c0_1 = arith.constant 0 : index
    %c0_2 = arith.constant 0 : index
    %1 = vector.load %arg2[%c0_1, %c0_2] : memref<20x256xbf16, #tpu.memory_space<vmem>>, vector<20x256xbf16>
    %cst = arith.constant dense<0.000000e+00> : vector<8x256xf32>
    %2 = tpu.matmul %0, %1, %cst {dimension_numbers = #tpu.dot_dimension_numbers<[1], [0], [0], [1], [0, 0, 1, 1], [], []>} : vector<8x20xbf16>, vector<20x256xbf16>, vector<8x256xf32> -> vector<8x256xf32>
    %c0_3 = arith.constant 0 : index
    %c0_4 = arith.constant 0 : index
    %3 = vector.load %arg3[%c0_3, %c0_4] : memref<1x256xf32, #tpu.memory_space<vmem>>, vector<1x256xf32>
    %4 = vector.broadcast %3 : vector<1x256xf32> to vector<8x256xf32>
    %5 = arith.addf %2, %4 : vector<8x256xf32>
    %cst_5 = arith.constant 0.000000e+00 : f32
    %6 = vector.broadcast %cst_5 : f32 to vector<8x256xf32>
    %7 = arith.maximumf %5, %6 : vector<8x256xf32>
    %8 = arith.truncf %7 : vector<8x256xf32> to vector<8x256xbf16>
    %c0_6 = arith.constant 0 : index
    %c0_7 = arith.constant 0 : index
    %9 = vector.load %arg4[%c0_6, %c0_7] : memref<256x128xbf16, #tpu.memory_space<vmem>>, vector<256x128xbf16>
    %cst_8 = arith.constant dense<0.000000e+00> : vector<8x128xf32>
    %10 = tpu.matmul %8, %9, %cst_8 {dimension_numbers = #tpu.dot_dimension_numbers<[1], [0], [0], [1], [0, 0, 1, 1], [], []>} : vector<8x256xbf16>, vector<256x128xbf16>, vector<8x128xf32> -> vector<8x128xf32>
    %c0_9 = arith.constant 0 : index
    %c0_10 = arith.constant 0 : index
    %11 = vector.load %arg5[%c0_9, %c0_10] : memref<1x128xf32, #tpu.memory_space<vmem>>, vector<1x128xf32>
    %12 = vector.broadcast %11 : vector<1x128xf32> to vector<8x128xf32>
    %13 = arith.addf %10, %12 : vector<8x128xf32>
    %c0_11 = arith.constant 0 : index
    %c0_12 = arith.constant 0 : index
    %14 = vector.load %arg6[%c0_11, %c0_12] : memref<8x128xf32, #tpu.memory_space<vmem>>, vector<8x128xf32>
    tpu.vector_store %arg6[%c0_11, %c0_12], %13 {strides = array<i32>} : memref<8x128xf32, #tpu.memory_space<vmem>>, vector<8x128xf32>,
    return
  }
  func.func @transform_0(%arg0: i32) -> (i32, i32) {
    %c0_i32 = arith.constant 0 : i32
    %c0_i32_0 = arith.constant 0 : i32
    return %arg0, %c0_i32 : i32, i32
  }
  func.func @transform_1(%arg0: i32) -> (i32, i32) {
    %c0_i32 = arith.constant 0 : i32
    %c0_i32_0 = arith.constant 0 : i32
    %c0_i32_1 = arith.constant 0 : i32
    return %c0_i32, %c0_i32_0 : i32, i32
  }
  func.func @transform_2(%arg0: i32) -> (i32, i32) {
    %c0_i32 = arith.constant 0 : i32
    %c0_i32_0 = arith.constant 0 : i32
    %c0_i32_1 = arith.constant 0 : i32
    return %c0_i32, %c0_i32_0 : i32, i32
  }
  func.func @transform_3(%arg0: i32) -> (i32, i32) {
    %c0_i32 = arith.constant 0 : i32
    %c0_i32_0 = arith.constant 0 : i32
    %c0_i32_1 = arith.constant 0 : i32
    return %c0_i32, %c0_i32_0 : i32, i32
  }
  func.func @transform_4(%arg0: i32) -> (i32, i32) {
    %c0_i32 = arith.constant 0 : i32
    %c0_i32_0 = arith.constant 0 : i32
    %c0_i32_1 = arith.constant 0 : i32
    return %c0_i32, %c0_i32_0 : i32, i32
  }
  func.func @transform_5(%arg0: i32) -> (i32, i32) {
    %c0_i32 = arith.constant 0 : i32
    %c0_i32_0 = arith.constant 0 : i32
    return %arg0, %c0_i32 : i32, i32
  }
}

</mosaic_0001>

<bundles_post_ra>
// kernel: tpu_custom_call.1
= control target key start
LH: loop header
LB: loop body
LE: loop exit
PB: predicated region body
PF: predicated region fallthrough
CT: control target
= control target key end

     0   :  { %10 = vsyncpa [#allocation3], 0  ;;  %s558_s0 = inlined_call_operand.hbm [shape: bf16[8,20], index: 0, kind: input, shape index: {}]   ;;  %s559_s1 = inlined_call_operand.hbm [shape: bf16[20,256], index: 1, kind: input, shape index: {}]   ;;  %s560_s2 = inlined_call_operand.vmem [shape: f32[1,256], index: 2, kind: input, shape index: {}]   ;;  %s561_s3 = inlined_call_operand.hbm [shape: bf16[256,128], index: 3, kind: input, shape index: {}]   ;;  %s562_s4 = inlined_call_operand.vmem [shape: f32[1,128], index: 4, kind: input, shape index: {}]   ;;  %s563_s5 = inlined_call_operand.hbm [shape: f32[8,128], index: 5, kind: output, shape index: {}]  }
   0x1   :  { %11 = vsyncpa [#allocation6], 0 }
   0x2   :  { %12 = vsyncpa [#allocation4], 0  ;;  %s501_s18 = smov [#allocation5]  }
   0x3   :  { %s28_s19 = sshll.u32 %s501_s18, 4  ;;  %s29_s19 = int_to_ptr.vmem [resolvable:$true] %s28_s19 }
   0x4   :  { %s423_s20 = scalar_lea.vmem %s29_s19, 384  ;;  %p428_p1 = scmp.lt.s32.totalorder %s29_s19, %s29_s19 }
   0x5   :  { %p424_p0 = scmp.ne.s32.totalorder %s29_s19, %s423_s20  ;;  %p429_p2 = scmp.lt.s32.totalorder %s423_s20, %s423_s20 }
   0x7   :  { %p430_p3 = por %p429_p2, %p428_p1 }
   0x9   :  { %p431_p4 = pnand %p430_p3, %p424_p0 }
   0xb   :  { %434 = shalt.err (!%p431_p4)
}
   0xc   :  { %s502_s21 = smov 128   ;;  %s503_s22 = smov 8  }
   0xd   :  { %34 = dma.hbm_to_vmem [thread:$0]  %s559_s1, 384, %s29_s19, [#allocation6], %s502_s21, %s502_s21, %s503_s22  }
   0xe   :  { %s504_s25 = smov [#allocation2]   ;;  %s505_s27 = smov [#allocation7]  }
   0xf   :  { %s19_s26 = sshll.u32 %s504_s25, 4  ;;  %s42_s28 = sshll.u32 %s505_s27, 4  ;;  %s20_s26 = int_to_ptr.vmem [resolvable:$true] %s19_s26  ;;  %s43_s28 = int_to_ptr.vmem [resolvable:$true] %s42_s28 }
  0x10   :  { %s443_s29 = scalar_lea.vmem %s20_s26, 64  ;;  %p448_p6 = scmp.lt.s32.totalorder %s20_s26, %s20_s26 }
  0x11   :  { %p444_p5 = scmp.ne.s32.totalorder %s20_s26, %s443_s29  ;;  %p449_p7 = scmp.lt.s32.totalorder %s443_s29, %s443_s29 }
  0x13   :  { %p450_p8 = por %p449_p7, %p448_p6 }
  0x15   :  { %p451_p9 = pnand %p450_p8, %p444_p5 }
  0x17   :  { %454 = shalt.err (!%p451_p9)
}
  0x18   :  { %22 = dma.hbm_to_vmem [thread:$0]  %s558_s0, 64, %s20_s26, [#allocation3]  }
  0x19   :  { %s463_s7 = scalar_lea.vmem %s43_s28, 2048  ;;  %p468_p11 = scmp.lt.s32.totalorder %s43_s28, %s43_s28 }
  0x1a   :  { %p464_p10 = scmp.ne.s32.totalorder %s43_s28, %s463_s7  ;;  %p469_p12 = scmp.lt.s32.totalorder %s463_s7, %s463_s7 }
  0x1c   :  { %p470_p13 = por %p469_p12, %p468_p11 }
  0x1e   :  { %p471_p0 = pnand %p470_p13, %p464_p10 }
  0x20   :  { %474 = shalt.err (!%p471_p0)
}
  0x21   :  { %s506_s1 = smov 64   ;;  %s507_s8 = smov 4  }
  0x22   :  { %48 = dma.hbm_to_vmem [thread:$0]  %s561_s3, 2048, %s43_s28, [#allocation6], %s506_s1, %s506_s1, %s507_s8  }
  0x23   :  { %495 = dma.done.wait [#allocation3], 64  }
  0x24   :  { %496 = vsyncadd [#allocation3], 4294967232 }
  0x25   :  { %497 = dma.done.wait [#allocation6], 2432  }
  0x26   :  { %498 = vsyncadd [#allocation6], 4294964864  ;;  %v508_v0 = vmov 0   ;;  %v64_v1 = vld [vmem:[#allocation5 + $0x10] sm:$0x33]  ;;  %vm96_vm0 = vcmask 1041408   ;;  %v67_v24 = vlaneseq }
  0x27   :  { %135 = vmatprep.mubr.bf16.mxu0 %v508_v0  ;;  %v343_v2 = vcombine.high %v64_v1, %v64_v1  ;;  %v342_v3 = vcombine.low %v64_v1, %v64_v1  ;;  %v396_v4 = vld [vmem:[#allocation5 + $0x4] ss:$8 sps:$4 sm:$0xff]   ;;  %v398_v5 = vld [vmem:[#allocation5] ss:$8 sps:$4 sm:$0xff]   ;;  %v399_v6 = vld [vmem:[#allocation7 + $0x78] sm:$0xff]   ;;  %vm92_vm1 = vcmask 162816  }
  0x28   :  { %v400_v8 = vld [vmem:[#allocation7 + $0x38] sm:$0xff]   ;;  %363 = vmatprep.subr.bf16.mxu1 %v399_v6  ;;  %v401_v9 = vld [vmem:[#allocation7 + $0x70] sm:$0xff]   ;;  %v403_v11 = vld [vmem:[#allocation7 + $0x68] sm:$0xff]   ;;  %v68_v25 = vshrl.u32 %v67_v24, 7 }
  0x29   :  { %344 = vmatprep.subr.msk.bf16.mxu0 %vm96_vm0, %v343_v2  ;;  %v98_v7 = vsel %vm96_vm0, %v342_v3, 0  ;;  %364 = vmatpush3.bf16.msra.mxu1 %v400_v8  ;;  %v402_v10 = vld [vmem:[#allocation7 + $0x30] sm:$0xff]   ;;  %v61_v12 = vld [vmem:[#allocation2] sm:$0xf]  ;;  %v404_v13 = vld [vmem:[#allocation7 + $0x28] sm:$0xff]  }
  0x2a   :  { %116 = vmatpush1.bf16.msra.mxu0 %v98_v7  ;;  %365 = vmatprep.subr.bf16.mxu1 %v401_v9  ;;  %v405_v14 = vld [vmem:[#allocation7 + $0x60] sm:$0xff]   ;;  %v407_v16 = vld [vmem:[#allocation7 + $0x58] sm:$0xff]   ;;  %v409_v18 = vld [vmem:[#allocation7 + $0x50] sm:$0xff]   ;;  %v69_v26 = vsub.s32 0, %v68_v25  ;;  %v73_v28 = vsub.s32 1, %v68_v25 }
  0x2b   :  { %117 = vmatprep.subr.bf16.mxu0 %v396_v4  ;;  %v406_v15 = vld [vmem:[#allocation7 + $0x20] sm:$0xff]   ;;  %v408_v17 = vld [vmem:[#allocation7 + $0x18] sm:$0xff]   ;;  %v410_v19 = vld [vmem:[#allocation7 + $0x10] sm:$0xff]  }
  0x2c   :  { %v411_v20 = vld [vmem:[#allocation7 + $0x48] sm:$0xff]   ;;  %v413_v22 = vld [vmem:[#allocation7 + $0x40] sm:$0xff]  }
  0x2d   :  { %366 = vmatpush3.bf16.msra.mxu1 %v402_v10  ;;  %v412_v21 = vld [vmem:[#allocation7 + $0x8] sm:$0xff]   ;;  %v414_v23 = vld [vmem:[#allocation7] sm:$0xff]  }
  0x2e   :  { %118 = vmatpush1.bf16.msra.mxu0 %v398_v5  ;;  %367 = vmatprep.subr.bf16.mxu1 %v403_v11  ;;  %v65_v27 = vld [vmem:[%s560_s2] sm:$0x3]  ;;  %s509_s2 = smov [#allocation8]  }
  0x2f   :  { %v70_v29 = vrot.slane %v65_v27, %v69_v26  ;;  %v74_v30 = vrot.slane %v65_v27, %v73_v28  ;;  %v346_v42 = vld [vmem:[%s562_s4] ss:$0 sm:$0xff]  ;;  %s330_s13 = sshll.u32 %s509_s2, 4  ;;  %s331_s13 = int_to_ptr.vmem [resolvable:$true] %s330_s13 }
  0x30   :  { %s475_s14 = scalar_lea.vmem %s331_s13, 128  ;;  %p480_p2 = scmp.lt.s32.totalorder %s331_s13, %s331_s13 }
  0x31   :  { %345 = vmatmul.mubr.msk.bf16.vlgmr.msra.gmra.mxu0 %vm92_vm1, %v61_v12  ;;  %368 = vmatpush3.bf16.msra.mxu1 %v404_v13  ;;  %p476_p1 = scmp.ne.s32.totalorder %s331_s13, %s475_s14  ;;  %p481_p3 = scmp.lt.s32.totalorder %s475_s14, %s475_s14 }
  0x32   :  { %369 = vmatprep.subr.bf16.mxu1 %v405_v14 }
  0x33   :  { %p482_p4 = por %p481_p3, %p480_p2 }
  0x35   :  { %370 = vmatpush3.bf16.msra.mxu1 %v406_v15  ;;  %p483_p5 = pnand %p482_p4, %p476_p1 }
  0x36   :  { %371 = vmatprep.subr.bf16.mxu1 %v407_v16 }
  0x39   :  { %372 = vmatpush3.bf16.msra.mxu1 %v408_v17 }
  0x3a   :  { %373 = vmatprep.subr.bf16.mxu1 %v409_v18 }
  0x3d   :  { %374 = vmatpush3.bf16.msra.mxu1 %v410_v19 }
  0x3e   :  { %375 = vmatprep.subr.bf16.mxu1 %v411_v20 }
  0x41   :  { %376 = vmatpush3.bf16.msra.mxu1 %v412_v21 }
  0x42   :  { %377 = vmatprep.subr.bf16.mxu1 %v413_v22 }
  0x45   :  { %378 = vmatpush3.bf16.msra.mxu1 %v414_v23 }
  0xf1   :  { %v137_v31 = vpop.f32.mrf.mxu0 }
  0xf2   :  { %v138_v32 = vadd.f32 %v137_v31, %v70_v29 }
  0xf3   :  { %v139_v33 = vpop.f32.mrf.mxu0 }
  0xf4   :  { %v140_v34 = vadd.f32 %v139_v33, %v74_v30  ;;  %v144_v35 = vmax.f32 %v138_v32, 0.0 }
  0xf5   :  { %v141_v36 = vpop.f32.mrf.mxu0 }
  0xf6   :  { %v145_v37 = vmax.f32 %v140_v34, 0.0  ;;  %v146_v40 = vpack.c.bf16 %v144_v35, %v144_v35 }
  0xf7   :  { %v142_v38 = vpop.f32.mrf.mxu0 }
  0xf8   :  { %v147_v39 = vpack.c.bf16 %v145_v37, %v145_v37 }
  0xfa   :  { %315 = vmatprep.mubr.bf16.mxu1 %v147_v39 }
  0xfb   :  { %316 = vmatmul.mubr.bf16.vlgmr.msra.gmra.mxu1 %v146_v40 }
 0x1bb   :  { %v379_v41 = vpop.f32.mrf.mxu1 }
 0x1bd   :  { %v380_v43 = vpop.f32.mrf.mxu1 }
 0x1be   :  { %v381_v44 = vadd.f32 %v380_v43, %v379_v41 }
 0x1bf   :  { %v382_v45 = vpop.f32.mrf.mxu1 }
 0x1c0   :  { %v318_v46 = vadd.f32 %v381_v44, %v346_v42 }
 0x1c1   :  { %v383_v47 = vpop.f32.mrf.mxu1 }
 0x1c2   :  { %323 = vst [vmem:[#allocation8] sm:$0xff] %v318_v46 }
 0x1c3   :  { %486 = shalt.err (!%p483_p5)
}
 0x1c4   :  { %333 = dma.vmem_to_hbm [thread:$0]  %s331_s13, 128, %s563_s5, [#allocation4]  }
 0x1c5   :  { %499 = dma.done.wait [#allocation4], 128  }
 0x1c6   :  { %500 = vsyncadd [#allocation4], 4294967168 }
 0x1c7   :  { %337 = vsyncpa [#allocation3], 1 }
 0x1c8   :  { %338 = vsyncpa [#allocation6], 1 }
 0x1c9   :  { %339 = vsyncpa [#allocation4], 1 }

</bundles_post_ra>
